<compile_context>
chip_gen: v7x
topology: tpu7x:2x2x1
jax: 0.10.0
libtpu: 0.0.40
codegen_flags: <defaults>
</compile_context>

<pallas_src>
import functools

import jax
import jax.numpy as jnp
from jax import lax
from jax.experimental import pallas as pl
from jax.experimental.pallas import tpu as pltpu

NEG = -1e30  # stands in for the -inf padding of max_pool2d


def _mixpool_kernel(x_ref, o_ref, *, K, S, P, H, W, Hq, Ho, Wo, alpha):
    """x_ref: (S*S*Hq, Wq, Bc) space-to-depth, zero-padded input tile.
       o_ref: (Ho, Wo, Bc) pooled output tile (planes on lanes)."""
    w_max = float(alpha)
    w_avg = (1.0 - float(alpha)) / float(K * K)

    ii = None   # output-row / output-col iotas, built once and reused
    jj = None
    mx = None   # running max  (max_pool path)
    sm = None   # running sum  (avg_pool path)

    for dh in range(K):
        ph, a0 = dh % S, dh // S
        # valid output-row range [lo_i, hi_i) for this tap (outside -> padding)
        lo_i = max(0, (P - dh + S - 1) // S)
        hi_i = min(Ho, (P + H - 1 - dh) // S + 1)
        for dw in range(K):
            pw, b0 = dw % S, dw // S
            lo_j = max(0, (P - dw + S - 1) // S)
            hi_j = min(Wo, (P + W - 1 - dw) // S + 1)

            base = (ph * S + pw) * Hq + a0
            tap = x_ref[base:base + Ho, b0:b0 + Wo, :]        # (Ho, Wo, Bc)

            # max path: padding must behave like -inf.  Only taps that can
            # actually touch the border (decided at trace time) get a mask.
            if lo_i > 0 or hi_i < Ho or lo_j > 0 or hi_j < Wo:
                if ii is None:
                    ii = lax.broadcasted_iota(jnp.int32, tap.shape, 0)
                    jj = lax.broadcasted_iota(jnp.int32, tap.shape, 1)
                valid = (ii >= lo_i) & (ii < hi_i) & (jj >= lo_j) & (jj < hi_j)
                tap_m = jnp.where(valid, tap, NEG)
            else:
                tap_m = tap

            mx = tap_m if mx is None else jnp.maximum(mx, tap_m)
            # avg path: zero padding is already correct (count_include_pad=True)
            sm = tap if sm is None else sm + tap

    o_ref[...] = w_max * mx + w_avg * sm


def mixpool(x, alpha, kernel_size, stride, padding):
    """x: (N, C, H, W).  Returns (N, C, Ho, Wo) float32."""
    N, C, H, W = x.shape
    K, S, P = int(kernel_size), int(stride), int(padding)
    alpha = float(alpha)

    Hp, Wp = H + 2 * P, W + 2 * P
    Ho = (Hp - K) // S + 1
    Wo = (Wp - K) // S + 1

    NC = N * C
    Bc = 128 if NC >= 128 else NC            # lane-dense channel tile when possible
    NCp = ((NC + Bc - 1) // Bc) * Bc

    # Round padded spatial extents up to multiples of the stride so the
    # space-to-depth reshape is exact (the extra rows/cols are never read).
    Hr = ((Hp + S - 1) // S) * S
    Wr = ((Wp + S - 1) // S) * S
    Hq, Wq = Hr // S, Wr // S

    # ---- layout plumbing: one pass over the data, fused by XLA -------------
    xt = jnp.transpose(x.reshape(NC, H, W).astype(jnp.float32), (1, 2, 0))   # (H, W, NC)
    xt = jnp.pad(xt, ((P, Hr - H - P), (P, Wr - W - P), (0, NCp - NC)))      # zeros
    # space-to-depth: tap (dh, dw) of output (i, j) lives at
    #   x_s2d[((dh % S) * S + dw % S) * Hq + dh // S + i, dw // S + j, c]
    x_s2d = xt.reshape(Hq, S, Wq, S, NCp).transpose(1, 3, 0, 2, 4)
    x_s2d = x_s2d.reshape(S * S * Hq, Wq, NCp)

    kernel = functools.partial(
        _mixpool_kernel, K=K, S=S, P=P, H=H, W=W, Hq=Hq, Ho=Ho, Wo=Wo, alpha=alpha)

    out = pl.pallas_call(
        kernel,
        out_shape=jax.ShapeDtypeStruct((Ho, Wo, NCp), jnp.float32),
        grid=(NCp // Bc,),
        in_specs=[pl.BlockSpec((S * S * Hq, Wq, Bc), lambda b: (0, 0, b))],
        out_specs=pl.BlockSpec((Ho, Wo, Bc), lambda b: (0, 0, b)),
        compiler_params=pltpu.CompilerParams(dimension_semantics=("parallel",)),
    )(x_s2d)

    out = out[:, :, :NC]                                   # drop channel padding
    return jnp.transpose(out, (2, 0, 1)).reshape(N, C, Ho, Wo)


def mixpool_ref(x, alpha, kernel_size, stride, padding):
    """Pure-JAX reference matching F.max_pool2d / F.avg_pool2d semantics."""
    K, S, P = kernel_size, stride, padding
    pad = [(0, 0), (0, 0), (P, P), (P, P)]
    mp = lax.reduce_window(x, -jnp.inf, lax.max, (1, 1, K, K), (1, 1, S, S), pad)
    sp = lax.reduce_window(x, 0.0, lax.add, (1, 1, K, K), (1, 1, S, S), pad)
    ap = sp / float(K * K)
    return alpha * mp + (1.0 - alpha) * ap


if __name__ == "__main__":
    # Module "parameters" (from __init__): kernel_size, stride, padding, alpha.
    kernel_size, stride, padding = 3, 2, 1
    alpha = 0.7

    key = jax.random.PRNGKey(0)
    N, C, H, W = 2, 4, 16, 16
    x = jax.random.normal(key, (N, C, H, W), dtype=jnp.float32)

    out = mixpool(x, alpha, kernel_size, stride, padding)
    out = jax.block_until_ready(out)

    ref = mixpool_ref(x, jnp.float32(alpha), kernel_size, stride, padding)
    assert out.shape == ref.shape, (out.shape, ref.shape)
    if not jnp.allclose(out, ref, atol=1e-4, rtol=1e-4):
        max_err = jnp.max(jnp.abs(out - ref))
        raise AssertionError(f"MixPool kernel mismatch, max abs err = {max_err}")

    print("KERNEL_OK")
</pallas_src>

<mosaic_0001>
module attributes {stable_mosaic.version = 11 : i64} {
  func.func @_mixpool_kernel(%arg0: i32, %arg1: memref<36x9x8xf32, #tpu.memory_space<vmem>>, %arg2: memref<8x8x8xf32, #tpu.memory_space<vmem>>) attributes {dimension_semantics = [#tpu.dimension_semantics<parallel>], iteration_bounds = array<i64: 1>, scalar_prefetch = 0 : i64, scratch_operands = 0 : i64, tpu.core_type = #tpu.core_type<tc>, window_params = [{transform_indices = @transform_0, window_bounds = array<i64: 36, 9, 8>}, {transform_indices = @transform_1, window_bounds = array<i64: 8, 8, 8>}]} {
    %c0 = arith.constant 0 : index
    %c0_0 = arith.constant 0 : index
    %c0_1 = arith.constant 0 : index
    %0 = vector.load %arg1[%c0, %c0_0, %c0_1] : memref<36x9x8xf32, #tpu.memory_space<vmem>>, vector<8x8x8xf32>
    %1 = tpu.iota {dimensions = array<i32: 0>} : vector<8x8x8xi32>
    %2 = tpu.iota {dimensions = array<i32: 1>} : vector<8x8x8xi32>
    %c1_i32 = arith.constant 1 : i32
    %3 = vector.broadcast %c1_i32 : i32 to vector<8x8x8xi32>
    %4 = arith.cmpi sge, %1, %3 : vector<8x8x8xi32>
    %c8_i32 = arith.constant 8 : i32
    %5 = vector.broadcast %c8_i32 : i32 to vector<8x8x8xi32>
    %6 = arith.cmpi slt, %1, %5 : vector<8x8x8xi32>
    %7 = arith.andi %4, %6 : vector<8x8x8xi1>
    %c1_i32_2 = arith.constant 1 : i32
    %8 = vector.broadcast %c1_i32_2 : i32 to vector<8x8x8xi32>
    %9 = arith.cmpi sge, %2, %8 : vector<8x8x8xi32>
    %10 = arith.andi %7, %9 : vector<8x8x8xi1>
    %c8_i32_3 = arith.constant 8 : i32
    %11 = vector.broadcast %c8_i32_3 : i32 to vector<8x8x8xi32>
    %12 = arith.cmpi slt, %2, %11 : vector<8x8x8xi32>
    %13 = arith.andi %10, %12 : vector<8x8x8xi1>
    %cst = arith.constant -1.000000e+30 : f32
    %14 = vector.broadcast %cst : f32 to vector<8x8x8xf32>
    %15 = arith.select %13, %0, %14 : vector<8x8x8xi1>, vector<8x8x8xf32>
    %c9 = arith.constant 9 : index
    %c0_4 = arith.constant 0 : index
    %c0_5 = arith.constant 0 : index
    %16 = vector.load %arg1[%c9, %c0_4, %c0_5] : memref<36x9x8xf32, #tpu.memory_space<vmem>>, vector<8x8x8xf32>
    %c1_i32_6 = arith.constant 1 : i32
    %17 = vector.broadcast %c1_i32_6 : i32 to vector<8x8x8xi32>
    %18 = arith.cmpi sge, %1, %17 : vector<8x8x8xi32>
    %c8_i32_7 = arith.constant 8 : i32
    %19 = vector.broadcast %c8_i32_7 : i32 to vector<8x8x8xi32>
    %20 = arith.cmpi slt, %1, %19 : vector<8x8x8xi32>
    %21 = arith.andi %18, %20 : vector<8x8x8xi1>
    %c0_i32 = arith.constant 0 : i32
    %22 = vector.broadcast %c0_i32 : i32 to vector<8x8x8xi32>
    %23 = arith.cmpi sge, %2, %22 : vector<8x8x8xi32>
    %24 = arith.andi %21, %23 : vector<8x8x8xi1>
    %c8_i32_8 = arith.constant 8 : i32
    %25 = vector.broadcast %c8_i32_8 : i32 to vector<8x8x8xi32>
    %26 = arith.cmpi slt, %2, %25 : vector<8x8x8xi32>
    %27 = arith.andi %24, %26 : vector<8x8x8xi1>
    %cst_9 = arith.constant -1.000000e+30 : f32
    %28 = vector.broadcast %cst_9 : f32 to vector<8x8x8xf32>
    %29 = arith.select %27, %16, %28 : vector<8x8x8xi1>, vector<8x8x8xf32>
    %30 = arith.maximumf %15, %29 : vector<8x8x8xf32>
    %31 = arith.addf %0, %16 : vector<8x8x8xf32>
    %c0_10 = arith.constant 0 : index
    %c1 = arith.constant 1 : index
    %c0_11 = arith.constant 0 : index
    %32 = vector.load %arg1[%c0_10, %c1, %c0_11] : memref<36x9x8xf32, #tpu.memory_space<vmem>>, vector<8x8x8xf32>
    %c1_i32_12 = arith.constant 1 : i32
    %33 = vector.broadcast %c1_i32_12 : i32 to vector<8x8x8xi32>
    %34 = arith.cmpi sge, %1, %33 : vector<8x8x8xi32>
    %c8_i32_13 = arith.constant 8 : i32
    %35 = vector.broadcast %c8_i32_13 : i32 to vector<8x8x8xi32>
    %36 = arith.cmpi slt, %1, %35 : vector<8x8x8xi32>
    %37 = arith.andi %34, %36 : vector<8x8x8xi1>
    %c0_i32_14 = arith.constant 0 : i32
    %38 = vector.broadcast %c0_i32_14 : i32 to vector<8x8x8xi32>
    %39 = arith.cmpi sge, %2, %38 : vector<8x8x8xi32>
    %40 = arith.andi %37, %39 : vector<8x8x8xi1>
    %c8_i32_15 = arith.constant 8 : i32
    %41 = vector.broadcast %c8_i32_15 : i32 to vector<8x8x8xi32>
    %42 = arith.cmpi slt, %2, %41 : vector<8x8x8xi32>
    %43 = arith.andi %40, %42 : vector<8x8x8xi1>
    %cst_16 = arith.constant -1.000000e+30 : f32
    %44 = vector.broadcast %cst_16 : f32 to vector<8x8x8xf32>
    %45 = arith.select %43, %32, %44 : vector<8x8x8xi1>, vector<8x8x8xf32>
    %46 = arith.maximumf %30, %45 : vector<8x8x8xf32>
    %47 = arith.addf %31, %32 : vector<8x8x8xf32>
    %c18 = arith.constant 18 : index
    %c0_17 = arith.constant 0 : index
    %c0_18 = arith.constant 0 : index
    %48 = vector.load %arg1[%c18, %c0_17, %c0_18] : memref<36x9x8xf32, #tpu.memory_space<vmem>>, vector<8x8x8xf32>
    %c0_i32_19 = arith.constant 0 : i32
    %49 = vector.broadcast %c0_i32_19 : i32 to vector<8x8x8xi32>
    %50 = arith.cmpi sge, %1, %49 : vector<8x8x8xi32>
    %c8_i32_20 = arith.constant 8 : i32
    %51 = vector.broadcast %c8_i32_20 : i32 to vector<8x8x8xi32>
    %52 = arith.cmpi slt, %1, %51 : vector<8x8x8xi32>
    %53 = arith.andi %50, %52 : vector<8x8x8xi1>
    %c1_i32_21 = arith.constant 1 : i32
    %54 = vector.broadcast %c1_i32_21 : i32 to vector<8x8x8xi32>
    %55 = arith.cmpi sge, %2, %54 : vector<8x8x8xi32>
    %56 = arith.andi %53, %55 : vector<8x8x8xi1>
    %c8_i32_22 = arith.constant 8 : i32
    %57 = vector.broadcast %c8_i32_22 : i32 to vector<8x8x8xi32>
    %58 = arith.cmpi slt, %2, %57 : vector<8x8x8xi32>
    %59 = arith.andi %56, %58 : vector<8x8x8xi1>
    %cst_23 = arith.constant -1.000000e+30 : f32
    %60 = vector.broadcast %cst_23 : f32 to vector<8x8x8xf32>
    %61 = arith.select %59, %48, %60 : vector<8x8x8xi1>, vector<8x8x8xf32>
    %62 = arith.maximumf %46, %61 : vector<8x8x8xf32>
    %63 = arith.addf %47, %48 : vector<8x8x8xf32>
    %c27 = arith.constant 27 : index
    %c0_24 = arith.constant 0 : index
    %c0_25 = arith.constant 0 : index
    %64 = vector.load %arg1[%c27, %c0_24, %c0_25] : memref<36x9x8xf32, #tpu.memory_space<vmem>>, vector<8x8x8xf32>
    %65 = arith.maximumf %62, %64 : vector<8x8x8xf32>
    %66 = arith.addf %63, %64 : vector<8x8x8xf32>
    %c18_26 = arith.constant 18 : index
    %c1_27 = arith.constant 1 : index
    %c0_28 = arith.constant 0 : index
    %67 = vector.load %arg1[%c18_26, %c1_27, %c0_28] : memref<36x9x8xf32, #tpu.memory_space<vmem>>, vector<8x8x8xf32>
    %68 = arith.maximumf %65, %67 : vector<8x8x8xf32>
    %69 = arith.addf %66, %67 : vector<8x8x8xf32>
    %c1_29 = arith.constant 1 : index
    %c0_30 = arith.constant 0 : index
    %c0_31 = arith.constant 0 : index
    %70 = vector.load %arg1[%c1_29, %c0_30, %c0_31] : memref<36x9x8xf32, #tpu.memory_space<vmem>>, vector<8x8x8xf32>
    %c0_i32_32 = arith.constant 0 : i32
    %71 = vector.broadcast %c0_i32_32 : i32 to vector<8x8x8xi32>
    %72 = arith.cmpi sge, %1, %71 : vector<8x8x8xi32>
    %c8_i32_33 = arith.constant 8 : i32
    %73 = vector.broadcast %c8_i32_33 : i32 to vector<8x8x8xi32>
    %74 = arith.cmpi slt, %1, %73 : vector<8x8x8xi32>
    %75 = arith.andi %72, %74 : vector<8x8x8xi1>
    %c1_i32_34 = arith.constant 1 : i32
    %76 = vector.broadcast %c1_i32_34 : i32 to vector<8x8x8xi32>
    %77 = arith.cmpi sge, %2, %76 : vector<8x8x8xi32>
    %78 = arith.andi %75, %77 : vector<8x8x8xi1>
    %c8_i32_35 = arith.constant 8 : i32
    %79 = vector.broadcast %c8_i32_35 : i32 to vector<8x8x8xi32>
    %80 = arith.cmpi slt, %2, %79 : vector<8x8x8xi32>
    %81 = arith.andi %78, %80 : vector<8x8x8xi1>
    %cst_36 = arith.constant -1.000000e+30 : f32
    %82 = vector.broadcast %cst_36 : f32 to vector<8x8x8xf32>
    %83 = arith.select %81, %70, %82 : vector<8x8x8xi1>, vector<8x8x8xf32>
    %84 = arith.maximumf %68, %83 : vector<8x8x8xf32>
    %85 = arith.addf %69, %70 : vector<8x8x8xf32>
    %c10 = arith.constant 10 : index
    %c0_37 = arith.constant 0 : index
    %c0_38 = arith.constant 0 : index
    %86 = vector.load %arg1[%c10, %c0_37, %c0_38] : memref<36x9x8xf32, #tpu.memory_space<vmem>>, vector<8x8x8xf32>
    %87 = arith.maximumf %84, %86 : vector<8x8x8xf32>
    %88 = arith.addf %85, %86 : vector<8x8x8xf32>
    %c1_39 = arith.constant 1 : index
    %c1_40 = arith.constant 1 : index
    %c0_41 = arith.constant 0 : index
    %89 = vector.load %arg1[%c1_39, %c1_40, %c0_41] : memref<36x9x8xf32, #tpu.memory_space<vmem>>, vector<8x8x8xf32>
    %90 = arith.maximumf %87, %89 : vector<8x8x8xf32>
    %91 = arith.addf %88, %89 : vector<8x8x8xf32>
    %cst_42 = arith.constant 0.699999988 : f32
    %92 = vector.broadcast %cst_42 : f32 to vector<8x8x8xf32>
    %93 = arith.mulf %92, %90 : vector<8x8x8xf32>
    %cst_43 = arith.constant 0.0333333351 : f32
    %94 = vector.broadcast %cst_43 : f32 to vector<8x8x8xf32>
    %95 = arith.mulf %94, %91 : vector<8x8x8xf32>
    %96 = arith.addf %93, %95 : vector<8x8x8xf32>
    %c0_44 = arith.constant 0 : index
    %c0_45 = arith.constant 0 : index
    %c0_46 = arith.constant 0 : index
    %97 = vector.load %arg2[%c0_44, %c0_45, %c0_46] : memref<8x8x8xf32, #tpu.memory_space<vmem>>, vector<8x8x8xf32>
    tpu.vector_store %arg2[%c0_44, %c0_45, %c0_46], %96 {strides = array<i32>} : memref<8x8x8xf32, #tpu.memory_space<vmem>>, vector<8x8x8xf32>,
    return
  }
  func.func @transform_0(%arg0: i32) -> (i32, i32, i32) {
    %c0_i32 = arith.constant 0 : i32
    %c0_i32_0 = arith.constant 0 : i32
    %c0_i32_1 = arith.constant 0 : i32
    return %c0_i32, %c0_i32_0, %arg0 : i32, i32, i32
  }
  func.func @transform_1(%arg0: i32) -> (i32, i32, i32) {
    %c0_i32 = arith.constant 0 : i32
    %c0_i32_0 = arith.constant 0 : i32
    %c0_i32_1 = arith.constant 0 : i32
    return %c0_i32, %c0_i32_0, %arg0 : i32, i32, i32
  }
}

</mosaic_0001>

<bundles_post_ra>
// kernel: tpu_custom_call.1
= control target key start
LH: loop header
LB: loop body
LE: loop exit
PB: predicated region body
PF: predicated region fallthrough
CT: control target
= control target key end

     0   :  { %v17_v1 = vlaneseq  ;;  %vm291_vm1 = vcmask 64512   ;;  %s662_s0 = inlined_call_operand.vmem [shape: f32[36,9,8], index: 0, kind: input, shape index: {}]   ;;  %s663_s1 = inlined_call_operand.hbm [shape: f32[8,8,8], index: 1, kind: output, shape index: {}]  }
   0x1   :  { %v9_v0 = vld [vmem:[%s662_s0] sm:$0xff]  ;;  %v316_v2 = vld [vmem:[%s662_s0 + $0x90] sm:$0xff] }
   0x2   :  { %v71_v3 = vld [vmem:[%s662_s0 + $0x1] sm:$0xff]  ;;  %v63_v4 = vadd.f32 %v316_v2, %v9_v0  ;;  %v424_v6 = vshrl.u32 %v17_v1, 7  ;;  %v348_v7 = vld [vmem:[%s662_s0 + $0x10] sm:$0xff] }
   0x3   :  { %v324_v5 = vld [vmem:[%s662_s0 + $0x120] sm:$0xff]  ;;  %v437_v9 = vld [vmem:[%s662_s0 + $0x11] sm:$0xff] }
   0x4   :  { %v432_v8 = vld [vmem:[%s662_s0 + $0xa0] sm:$0xff]  ;;  %v95_v10 = vadd.f32 %v71_v3, %v63_v4  ;;  %v332_v11 = vld [vmem:[%s662_s0 + $0x1b0] sm:$0xff]  ;;  %vm19_vm0 = vcmp.ge.s32.totalorder %v424_v6, 1 }
   0x5   :  { %v64_v12 = vadd.f32 %v432_v8, %v348_v7  ;;  %v325_v13 = vld [vmem:[%s662_s0 + $0x130] sm:$0xff]  ;;  %v340_v14 = vld [vmem:[%s662_s0 + $0x121] sm:$0xff]  ;;  %v112_v18 = vsel %vm19_vm0, %v324_v5, -1e+30  ;;  %v194_v20 = vsel %vm19_vm0, %v348_v7, -1e+30 }
   0x6   :  { %v333_v15 = vld [vmem:[%s662_s0 + $0x1c0] sm:$0xff]  ;;  %v459_v17 = vld [vmem:[%s662_s0 + $0xb0] sm:$0xff]  ;;  %v128_v19 = vadd.f32 %v324_v5, %v95_v10  ;;  %v120_v24 = vmax.f32 %v112_v18, -1e+30  ;;  %v56_v25 = vmax.f32 %v194_v20, %v432_v8  ;;  %v113_v26 = vsel %vm19_vm0, %v325_v13, -1e+30 }
   0x7   :  { %v349_v16 = vld [vmem:[%s662_s0 + $0x20] sm:$0xff]  ;;  %v96_v21 = vadd.f32 %v437_v9, %v64_v12  ;;  %v350_v32 = vld [vmem:[%s662_s0 + $0x30] sm:$0xff] }
   0x8   :  { %v469_v22 = vld [vmem:[%s662_s0 + $0x21] sm:$0xff]  ;;  %v195_v27 = vsel %vm19_vm0, %v349_v16, -1e+30  ;;  %v153_v28 = vadd.f32 %v332_v11, %v128_v19  ;;  %v65_v31 = vadd.f32 %v459_v17, %v349_v16  ;;  %v145_v34 = vmax.f32 %v120_v24, %v332_v11  ;;  %v341_v36 = vld [vmem:[%s662_s0 + $0x131] sm:$0xff] }
   0x9   :  { %v326_v23 = vld [vmem:[%s662_s0 + $0x140] sm:$0xff]  ;;  %v129_v29 = vadd.f32 %v325_v13, %v96_v21  ;;  %v57_v30 = vmax.f32 %v195_v27, %v459_v17  ;;  %v88_v35 = vmax.f32 %v56_v25, %v437_v9  ;;  %v196_v38 = vsel %vm19_vm0, %v350_v32, -1e+30  ;;  %v366_v43 = vld [vmem:[%s662_s0 + $0x31] sm:$0xff] }
   0xa   :  { %v487_v33 = vld [vmem:[%s662_s0 + $0xc0] sm:$0xff]  ;;  %v114_v37 = vsel %vm19_vm0, %v326_v23, -1e+30  ;;  %v177_v39 = vadd.f32 %v340_v14, %v153_v28  ;;  %v97_v42 = vadd.f32 %v469_v22, %v65_v31  ;;  %v169_v44 = vmax.f32 %v145_v34, %v340_v14  ;;  %v334_v46 = vld [vmem:[%s662_s0 + $0x1d0] sm:$0xff] }
   0xb   :  { %v154_v40 = vadd.f32 %v333_v15, %v129_v29  ;;  %v89_v41 = vmax.f32 %v57_v30, %v469_v22  ;;  %v121_v45 = vmax.f32 %v88_v35, %v113_v26  ;;  %v58_v47 = vmax.f32 %v196_v38, %v487_v33  ;;  %v327_v53 = vld [vmem:[%s662_s0 + $0x150] sm:$0xff]  ;;  %v342_v56 = vld [vmem:[%s662_s0 + $0x141] sm:$0xff] }
   0xc   :  { %v66_v48 = vadd.f32 %v487_v33, %v350_v32  ;;  %v210_v49 = vadd.f32 %v348_v7, %v177_v39  ;;  %v130_v52 = vadd.f32 %v326_v23, %v97_v42  ;;  %v202_v54 = vmax.f32 %v169_v44, %v194_v20  ;;  %v335_v63 = vld [vmem:[%s662_s0 + $0x1e0] sm:$0xff]  ;;  %v343_v11 = vld [vmem:[%s662_s0 + $0x151] sm:$0xff] }
   0xd   :  { %v178_v50 = vadd.f32 %v341_v36, %v154_v40  ;;  %v122_v51 = vmax.f32 %v89_v41, %v114_v37  ;;  %v146_v55 = vmax.f32 %v121_v45, %v333_v15  ;;  %v90_v57 = vmax.f32 %v58_v47, %v366_v43  ;;  %v351_v15 = vld [vmem:[%s662_s0 + $0x40] sm:$0xff] }
   0xe   :  { %v98_v58 = vadd.f32 %v366_v43, %v66_v48  ;;  %v235_v59 = vadd.f32 %v432_v8, %v210_v49  ;;  %v155_v62 = vadd.f32 %v334_v46, %v130_v52  ;;  %v227_v0 = vmax.f32 %v202_v54, %v432_v8 }
   0xf   :  { %v211_v60 = vadd.f32 %v349_v16, %v178_v50  ;;  %v147_v61 = vmax.f32 %v122_v51, %v334_v46  ;;  %v170_v1 = vmax.f32 %v146_v55, %v341_v36  ;;  %v115_v2 = vsel %vm19_vm0, %v327_v53, -1e+30 }
  0x10   :  { %v131_v3 = vadd.f32 %v327_v53, %v98_v58  ;;  %v259_v4 = vadd.f32 %v437_v9, %v235_v59  ;;  %v179_v10 = vadd.f32 %v342_v56, %v155_v62  ;;  %v251_v12 = vmax.f32 %v227_v0, %v437_v9  ;;  %v359_v9 = vld [vmem:[%s662_s0 + $0xd0] sm:$0xff] }
  0x11   :  { %v236_v5 = vadd.f32 %v459_v17, %v211_v60  ;;  %v171_v7 = vmax.f32 %v147_v61, %v342_v56  ;;  %v203_v13 = vmax.f32 %v170_v1, %v195_v27  ;;  %v123_v14 = vmax.f32 %v90_v57, %v115_v2 }
  0x12   :  { %v156_v8 = vadd.f32 %v335_v63, %v131_v3  ;;  %v275_v16 = vmul.f32 0.033333335, %v259_v4  ;;  %v212_v20 = vadd.f32 %v350_v32, %v179_v10  ;;  %v267_v21 = vmul.f32 0.7, %v251_v12 }
  0x13   :  { %v260_v18 = vadd.f32 %v469_v22, %v236_v5  ;;  %v204_v19 = vmax.f32 %v171_v7, %v196_v38  ;;  %v228_v23 = vmax.f32 %v203_v13, %v459_v17  ;;  %v148_v24 = vmax.f32 %v123_v14, %v335_v63 }
  0x14   :  { %v180_v25 = vadd.f32 %v343_v11, %v156_v8 }
  0x15   :  { %6 = vsyncpa [#allocation3], 0  ;;  %v276_v26 = vmul.f32 0.033333335, %v260_v18  ;;  %v229_v27 = vmax.f32 %v204_v19, %v487_v33  ;;  %v237_v28 = vadd.f32 %v487_v33, %v212_v20  ;;  %v197_v29 = vsel %vm19_vm0, %v351_v15, -1e+30 }
  0x16   :  { %v328_v30 = vld [vmem:[%s662_s0 + $0x160] sm:$0xff]  ;;  %v283_v17 = vadd.f32 %v275_v16, %v267_v21  ;;  %v252_v31 = vmax.f32 %v228_v23, %v469_v22  ;;  %v172_v32 = vmax.f32 %v148_v24, %v343_v11  ;;  %v213_v34 = vadd.f32 %v351_v15, %v180_v25  ;;  %v352_v39 = vld [vmem:[%s662_s0 + $0x50] sm:$0xff]  ;;  %s399_s21 = smov [#allocation2]  }
  0x17   :  { %v367_v35 = vld [vmem:[%s662_s0 + $0x41] sm:$0xff]  ;;  %v253_v36 = vmax.f32 %v229_v27, %v366_v43  ;;  %v261_v37 = vadd.f32 %v366_v43, %v237_v28  ;;  %v59_v38 = vmax.f32 %v197_v29, %v359_v9  ;;  %v67_v33 = vadd.f32 %v359_v9, %v351_v15  ;;  %v329_v48 = vld [vmem:[%s662_s0 + $0x170] sm:$0xff]  ;;  %s305_s22 = sshll.u32 %s399_s21, 4  ;;  %s306_s22 = int_to_ptr.vmem [resolvable:$true] %s305_s22 }
  0x18   :  { %292 = vst.msk [vmem:[#allocation2] sm:$0xff] %vm291_vm1, %v283_v17  ;;  %v268_v40 = vmul.f32 0.7, %v252_v31  ;;  %v205_v41 = vmax.f32 %v172_v32, %v197_v29  ;;  %v238_v42 = vadd.f32 %v359_v9, %v213_v34  ;;  %v116_v22 = vsel %vm19_vm0, %v328_v30, -1e+30  ;;  %v554_v44 = vld [vmem:[%s662_s0 + $0xe0] sm:$0xff]  ;;  %p380_p1 = scmp.lt.s32.totalorder %s306_s22, %s306_s22 }
  0x19   :  { %v269_v43 = vmul.f32 0.7, %v253_v36  ;;  %v277_v45 = vmul.f32 0.033333335, %v261_v37  ;;  %v91_v46 = vmax.f32 %v59_v38, %v367_v35  ;;  %v99_v47 = vadd.f32 %v367_v35, %v67_v33  ;;  %v336_v52 = vld [vmem:[%s662_s0 + $0x1f0] sm:$0xff]  ;;  %v353_v55 = vld [vmem:[%s662_s0 + $0x60] sm:$0xff] }
  0x1a   :  { %v284_v49 = vadd.f32 %v276_v26, %v268_v40  ;;  %v230_v50 = vmax.f32 %v205_v41, %v359_v9  ;;  %v262_v51 = vadd.f32 %v367_v35, %v238_v42  ;;  %v198_v53 = vsel %vm19_vm0, %v352_v39, -1e+30  ;;  %v368_v54 = vld [vmem:[%s662_s0 + $0x51] sm:$0xff]  ;;  %v344_v63 = vld [vmem:[%s662_s0 + $0x161] sm:$0xff]  ;;  %s375_s23 = scalar_lea.vmem %s306_s22, 1024 }
  0x1b   :  { %v285_v56 = vadd.f32 %v277_v45, %v269_v43  ;;  %v124_v57 = vmax.f32 %v91_v46, %v116_v22  ;;  %v132_v58 = vadd.f32 %v328_v30, %v99_v47  ;;  %v60_v59 = vmax.f32 %v198_v53, %v554_v44  ;;  %v574_v60 = vld [vmem:[%s662_s0 + $0xf0] sm:$0xff]  ;;  %v330_v2 = vld [vmem:[%s662_s0 + $0x180] sm:$0xff]  ;;  %p376_p0 = scmp.ne.s32.totalorder %s306_s22, %s375_s23  ;;  %p381_p2 = scmp.lt.s32.totalorder %s375_s23, %s375_s23 }
  0x1c   :  { %293 = vst.msk [vmem:[#allocation2 + $0x8] sm:$0xff] %vm291_vm1, %v284_v49  ;;  %v254_v61 = vmax.f32 %v230_v50, %v367_v35  ;;  %v278_v62 = vmul.f32 0.033333335, %v262_v51  ;;  %v68_v0 = vadd.f32 %v554_v44, %v352_v39  ;;  %v117_v1 = vsel %vm19_vm0, %v329_v48, -1e+30  ;;  %v369_v10 = vld [vmem:[%s662_s0 + $0x61] sm:$0xff] }
  0x1d   :  { %294 = vst.msk [vmem:[#allocation2 + $0x10] sm:$0xff] %vm291_vm1, %v285_v56  ;;  %v149_v3 = vmax.f32 %v124_v57, %v336_v52  ;;  %v157_v4 = vadd.f32 %v336_v52, %v132_v58  ;;  %v92_v5 = vmax.f32 %v60_v59, %v368_v54  ;;  %v199_v7 = vsel %vm19_vm0, %v353_v55, -1e+30  ;;  %v337_v13 = vld [vmem:[%s662_s0 + $0x200] sm:$0xff]  ;;  %v354_v15 = vld [vmem:[%s662_s0 + $0x70] sm:$0xff]  ;;  %p382_p3 = por %p381_p2, %p380_p1 }
  0x1e   :  { %v270_v11 = vmul.f32 0.7, %v254_v61  ;;  %v100_v12 = vadd.f32 %v368_v54, %v68_v0  ;;  %v61_v14 = vmax.f32 %v199_v7, %v574_v60  ;;  %v69_v8 = vadd.f32 %v574_v60, %v353_v55  ;;  %v362_v21 = vld [vmem:[%s662_s0 + $0x100] sm:$0xff]  ;;  %v345_v25 = vld [vmem:[%s662_s0 + $0x171] sm:$0xff] }
  0x1f   :  { %v173_v16 = vmax.f32 %v149_v3, %v344_v63  ;;  %v181_v18 = vadd.f32 %v344_v63, %v157_v4  ;;  %v125_v19 = vmax.f32 %v92_v5, %v117_v1  ;;  %v118_v20 = vsel %vm19_vm0, %v330_v2, -1e+30  ;;  %v338_v30 = vld [vmem:[%s662_s0 + $0x210] sm:$0xff]  ;;  %v355_v56 = vld [vmem:[%s662_s0 + $0x80] sm:$0xff]  ;;  %p383_p4 = pnand %p382_p3, %p376_p0 }
  0x20   :  { %v286_v23 = vadd.f32 %v278_v62, %v270_v11  ;;  %v133_v24 = vadd.f32 %v329_v48, %v100_v12  ;;  %v93_v9 = vmax.f32 %v61_v14, %v369_v10  ;;  %v101_v26 = vadd.f32 %v369_v10, %v69_v8  ;;  %v370_v31 = vld [vmem:[%s662_s0 + $0x71] sm:$0xff] }
  0x21   :  { %v206_v27 = vmax.f32 %v173_v16, %v198_v53  ;;  %v214_v28 = vadd.f32 %v352_v39, %v181_v18  ;;  %v150_v29 = vmax.f32 %v125_v19, %v337_v13  ;;  %v200_v17 = vsel %vm19_vm0, %v354_v15, -1e+30  ;;  %v346_v39 = vld [vmem:[%s662_s0 + $0x181] sm:$0xff]  ;;  %v331_v41 = vld [vmem:[%s662_s0 + $0x190] sm:$0xff] }
  0x22   :  { %295 = vst.msk [vmem:[#allocation2 + $0x18] sm:$0xff] %vm291_vm1, %v286_v23  ;;  %v158_v32 = vadd.f32 %v337_v13, %v133_v24  ;;  %v126_v34 = vmax.f32 %v93_v9, %v118_v20  ;;  %v134_v35 = vadd.f32 %v330_v2, %v101_v26  ;;  %v62_v36 = vmax.f32 %v200_v17, %v362_v21  ;;  %v339_v53 = vld [vmem:[%s662_s0 + $0x220] sm:$0xff]  ;;  %v347_v0 = vld [vmem:[%s662_s0 + $0x191] sm:$0xff] }
  0x23   :  { %v231_v37 = vmax.f32 %v206_v27, %v554_v44  ;;  %v239_v38 = vadd.f32 %v554_v44, %v214_v28  ;;  %v174_v33 = vmax.f32 %v150_v29, %v345_v25  ;;  %v70_v40 = vadd.f32 %v362_v21, %v354_v15  ;;  %v363_v18 = vld [vmem:[%s662_s0 + $0x110] sm:$0xff] }
  0x24   :  { %v182_v42 = vadd.f32 %v345_v25, %v158_v32  ;;  %v151_v22 = vmax.f32 %v126_v34, %v338_v30  ;;  %v159_v43 = vadd.f32 %v338_v30, %v134_v35  ;;  %v94_v45 = vmax.f32 %v62_v36, %v370_v31 }
  0x25   :  { %v255_v46 = vmax.f32 %v231_v37, %v368_v54  ;;  %v263_v47 = vadd.f32 %v368_v54, %v239_v38  ;;  %v207_v48 = vmax.f32 %v174_v33, %v199_v7  ;;  %v102_v49 = vadd.f32 %v370_v31, %v70_v40 }
  0x26   :  { %v215_v50 = vadd.f32 %v353_v55, %v182_v42  ;;  %v175_v44 = vmax.f32 %v151_v22, %v346_v39  ;;  %v183_v51 = vadd.f32 %v346_v39, %v159_v43  ;;  %v119_v52 = vsel %vm19_vm0, %v331_v41, -1e+30 }
  0x27   :  { %v271_v57 = vmul.f32 0.7, %v255_v46  ;;  %v279_v58 = vmul.f32 0.033333335, %v263_v47  ;;  %v232_v54 = vmax.f32 %v207_v48, %v574_v60  ;;  %v127_v59 = vmax.f32 %v94_v45, %v119_v52 }
  0x28   :  { %v240_v55 = vadd.f32 %v574_v60, %v215_v50  ;;  %v208_v61 = vmax.f32 %v175_v44, %v200_v17  ;;  %v216_v62 = vadd.f32 %v354_v15, %v183_v51  ;;  %v135_v63 = vadd.f32 %v331_v41, %v102_v49 }
  0x29   :  { %v287_v1 = vadd.f32 %v279_v58, %v271_v57  ;;  %v256_v2 = vmax.f32 %v232_v54, %v369_v10  ;;  %v152_v3 = vmax.f32 %v127_v59, %v339_v53  ;;  %v201_v4 = vsel %vm19_vm0, %v355_v56, -1e+30 }
  0x2a   :  { %v264_v5 = vadd.f32 %v369_v10, %v240_v55  ;;  %v233_v7 = vmax.f32 %v208_v61, %v362_v21  ;;  %v241_v11 = vadd.f32 %v362_v21, %v216_v62  ;;  %v160_v12 = vadd.f32 %v339_v53, %v135_v63  ;;  %v371_v21 = vld [vmem:[%s662_s0 + $0x81] sm:$0xff] }
  0x2b   :  { %296 = vst.msk [vmem:[#allocation2 + $0x20] sm:$0xff] %vm291_vm1, %v287_v1  ;;  %v272_v60 = vmul.f32 0.7, %v256_v2  ;;  %v176_v13 = vmax.f32 %v152_v3, %v347_v0 }
  0x2c   :  { %v280_v14 = vmul.f32 0.033333335, %v264_v5  ;;  %v257_v8 = vmax.f32 %v233_v7, %v370_v31  ;;  %v265_v15 = vadd.f32 %v370_v31, %v241_v11  ;;  %v184_v16 = vadd.f32 %v347_v0, %v160_v12 }
  0x2d   :  { %v209_v19 = vmax.f32 %v176_v13, %v201_v4 }
  0x2e   :  { %v288_v20 = vadd.f32 %v280_v14, %v272_v60  ;;  %v273_v6 = vmul.f32 0.7, %v257_v8  ;;  %v281_v23 = vmul.f32 0.033333335, %v265_v15  ;;  %v217_v10 = vadd.f32 %v355_v56, %v184_v16 }
  0x2f   :  { %v234_v24 = vmax.f32 %v209_v19, %v363_v18 }
  0x30   :  { %297 = vst.msk [vmem:[#allocation2 + $0x28] sm:$0xff] %vm291_vm1, %v288_v20  ;;  %v289_v25 = vadd.f32 %v281_v23, %v273_v6  ;;  %v242_v9 = vadd.f32 %v363_v18, %v217_v10 }
  0x31   :  { %v258_v26 = vmax.f32 %v234_v24, %v371_v21 }
  0x32   :  { %298 = vst.msk [vmem:[#allocation2 + $0x30] sm:$0xff] %vm291_vm1, %v289_v25  ;;  %v266_v27 = vadd.f32 %v371_v21, %v242_v9 }
  0x33   :  { %v274_v28 = vmul.f32 0.7, %v258_v26 }
  0x34   :  { %v282_v29 = vmul.f32 0.033333335, %v266_v27 }
  0x36   :  { %v290_v30 = vadd.f32 %v282_v29, %v274_v28 }
  0x38   :  { %299 = vst.msk [vmem:[#allocation2 + $0x38] sm:$0xff] %vm291_vm1, %v290_v30 }
  0x39   :  { %386 = shalt.err (!%p383_p4)
}
  0x3a   :  { %s387_s25 = scalar_lea.hbm %s663_s1, 1024 }
  0x3b   :  { %p388_p5 = scmp.ne.s32.totalorder %s663_s1, %s387_s25  ;;  %p391_p6 = scmp.lt.u32.totalorder %s387_s25, %s663_s1 }
  0x3d   :  { %p393_p7 = pnand %p391_p6, %p388_p5 }
  0x3f   :  { %396 = shalt.err (!%p393_p7)
}
  0x40   :  { %s400_s30 = smov 128   ;;  %s401_s2 = smov 8  }
  0x41   :  { %311 = dma.vmem_to_hbm [thread:$0]  %s306_s22, 1024, %s663_s1, [#allocation3], %s400_s30, %s400_s30, %s401_s2  }
  0x42   :  { %397 = dma.done.wait [#allocation3], 1024  }
  0x43   :  { %398 = vsyncadd [#allocation3], 4294966272 }
  0x44   :  { %315 = vsyncpa [#allocation3], 1 }

</bundles_post_ra>
